<compile_context>
chip_gen: v7x
topology: tpu7x:2x2x1
jax: 0.10.0
libtpu: 0.0.40
codegen_flags: <defaults>
</compile_context>

<pallas_src>
import math
from functools import partial

import numpy as np
import jax
import jax.numpy as jnp
from jax.experimental import pallas as pl
from jax.experimental.pallas import tpu as pltpu

IGNORE_ID = -1
NEG_INF = -1e30


def _round_up(x, m):
    return (x + m - 1) // m * m


def _vmem_limit_bytes():
    # Generation-aware VMEM budget: ~75% of physical, capped at 100 MiB.
    # v5e/v6e (128 MiB) -> 96 MiB ; v7x (64 MiB per TC) -> 48 MiB.
    try:
        cap = int(pltpu.get_tpu_info().vmem_capacity_bytes)
        return int(min(cap * 3 // 4, 100 * 1024 * 1024))
    except Exception:
        return 48 * 1024 * 1024


_VMEM_LIMIT = _vmem_limit_bytes()


def _pad2d(x, rows, cols):
    r, c = x.shape
    if r == rows and c == cols:
        return x
    return jnp.pad(x, ((0, rows - r), (0, cols - c)))


# ----------------------------------------------------------------------------
# Kernel 1: tiled linear  y = x @ W + b  (optional ReLU)
#   - single-K-tile fast path (no accumulator scratch / predicated branches)
#   - K-tiled path with f32 VMEM accumulator otherwise
#   - output dtype selectable (bf16 for activation streams feeding matmuls)
# ----------------------------------------------------------------------------

def _matmul_nok_kernel(act, x_ref, w_ref, b_ref, o_ref):
    y = jnp.dot(x_ref[...], w_ref[...],
                preferred_element_type=jnp.float32) + b_ref[...]
    if act == "relu":
        y = jnp.maximum(y, 0.0)
    o_ref[...] = y.astype(o_ref.dtype)


def _matmul_kernel(act, x_ref, w_ref, b_ref, o_ref, acc_ref):
    @pl.when(pl.program_id(2) == 0)
    def _():
        acc_ref[...] = jnp.zeros_like(acc_ref)

    acc_ref[...] += jnp.dot(x_ref[...], w_ref[...],
                            preferred_element_type=jnp.float32)

    @pl.when(pl.program_id(2) == pl.num_programs(2) - 1)
    def _():
        y = acc_ref[...] + b_ref[...]
        if act == "relu":
            y = jnp.maximum(y, 0.0)
        o_ref[...] = y.astype(o_ref.dtype)


def pallas_linear(x2d, w, b, act=None, out_dtype=jnp.float32,
                  tm=256, tn=256, tk=1024):
    M, K = x2d.shape
    N = w.shape[1]
    tm = min(tm, _round_up(M, 16))
    tn = min(tn, _round_up(N, 128))
    tk = min(tk, _round_up(K, 128))
    Mp, Kp, Np = _round_up(M, tm), _round_up(K, tk), _round_up(N, tn)
    xp = _pad2d(x2d, Mp, Kp).astype(jnp.bfloat16)        # bf16 MXU operands
    wp = _pad2d(w, Kp, Np).astype(jnp.bfloat16)
    bp = _pad2d(b.reshape(1, N).astype(jnp.float32), 1, Np)

    if Kp // tk == 1:
        out = pl.pallas_call(
            partial(_matmul_nok_kernel, act),
            out_shape=jax.ShapeDtypeStruct((Mp, Np), out_dtype),
            grid=(Mp // tm, Np // tn),
            in_specs=[
                pl.BlockSpec((tm, Kp), lambda i, j: (i, 0)),
                pl.BlockSpec((Kp, tn), lambda i, j: (0, j)),
                pl.BlockSpec((1, tn), lambda i, j: (0, j)),
            ],
            out_specs=pl.BlockSpec((tm, tn), lambda i, j: (i, j)),
            compiler_params=pltpu.CompilerParams(
                dimension_semantics=("parallel", "parallel"),
                vmem_limit_bytes=_VMEM_LIMIT),
        )(xp, wp, bp)
    else:
        out = pl.pallas_call(
            partial(_matmul_kernel, act),
            out_shape=jax.ShapeDtypeStruct((Mp, Np), out_dtype),
            grid=(Mp // tm, Np // tn, Kp // tk),
            in_specs=[
                pl.BlockSpec((tm, tk), lambda i, j, k: (i, k)),
                pl.BlockSpec((tk, tn), lambda i, j, k: (k, j)),
                pl.BlockSpec((1, tn), lambda i, j, k: (0, j)),
            ],
            out_specs=pl.BlockSpec((tm, tn), lambda i, j, k: (i, j)),
            scratch_shapes=[pltpu.VMEM((tm, tn), jnp.float32)],
            compiler_params=pltpu.CompilerParams(
                dimension_semantics=("parallel", "parallel", "arbitrary"),
                vmem_limit_bytes=_VMEM_LIMIT),
        )(xp, wp, bp)
    return out[:M, :N]


# ----------------------------------------------------------------------------
# Kernel 2: fused LayerNorm + linear (pre-norm blocks).  The normalized bf16
# row block is computed once (j == 0) into VMEM scratch and reused for every
# output-column tile j.
# ----------------------------------------------------------------------------

def _ln_matmul_kernel(eps, act, x_ref, g_ref, beta_ref, w_ref, b_ref, o_ref,
                      xn_sc):
    @pl.when(pl.program_id(1) == 0)
    def _():
        x = x_ref[...]                                    # (tm, D) f32
        mean = jnp.mean(x, axis=-1, keepdims=True)
        var = jnp.mean(jnp.square(x - mean), axis=-1, keepdims=True)
        xn_sc[...] = ((x - mean) * jax.lax.rsqrt(var + eps) * g_ref[...]
                      + beta_ref[...]).astype(jnp.bfloat16)

    y = jnp.dot(xn_sc[...], w_ref[...],
                preferred_element_type=jnp.float32) + b_ref[...]
    if act == "relu":
        y = jnp.maximum(y, 0.0)
    o_ref[...] = y.astype(o_ref.dtype)


def pallas_ln_linear(x2d, g, beta, w, b, act=None, out_dtype=jnp.float32,
                     eps=1e-5, tm=256, tn=256):
    M, D = x2d.shape
    N = w.shape[1]
    tm = min(tm, _round_up(M, 16))
    tn = min(tn, _round_up(N, 128))
    Mp, Np = _round_up(M, tm), _round_up(N, tn)
    xp = _pad2d(x2d, Mp, D)
    wp = _pad2d(w, D, Np).astype(jnp.bfloat16)
    bp = _pad2d(b.reshape(1, N).astype(jnp.float32), 1, Np)
    out = pl.pallas_call(
        partial(_ln_matmul_kernel, eps, act),
        out_shape=jax.ShapeDtypeStruct((Mp, Np), out_dtype),
        grid=(Mp // tm, Np // tn),
        in_specs=[
            pl.BlockSpec((tm, D), lambda i, j: (i, 0)),
            pl.BlockSpec((1, D), lambda i, j: (0, 0)),
            pl.BlockSpec((1, D), lambda i, j: (0, 0)),
            pl.BlockSpec((D, tn), lambda i, j: (0, j)),
            pl.BlockSpec((1, tn), lambda i, j: (0, j)),
        ],
        out_specs=pl.BlockSpec((tm, tn), lambda i, j: (i, j)),
        scratch_shapes=[pltpu.VMEM((tm, D), jnp.bfloat16)],
        compiler_params=pltpu.CompilerParams(
            dimension_semantics=("parallel", "arbitrary"),
            vmem_limit_bytes=_VMEM_LIMIT),
    )(xp, g.reshape(1, D), beta.reshape(1, D), wp, bp)
    return out[:M, :N]


# ----------------------------------------------------------------------------
# Kernel 3: standalone LayerNorm (final norms), row-tiled (f32 math)
# ----------------------------------------------------------------------------

def _layernorm_kernel(eps, x_ref, g_ref, b_ref, o_ref):
    x = x_ref[...]
    mean = jnp.mean(x, axis=-1, keepdims=True)
    var = jnp.mean(jnp.square(x - mean), axis=-1, keepdims=True)
    o_ref[...] = (x - mean) * jax.lax.rsqrt(var + eps) * g_ref[...] + b_ref[...]


def pallas_layernorm(x2d, g, b, eps=1e-5, tm=256):
    M, D = x2d.shape
    tm = min(tm, _round_up(M, 8))
    Mp = _round_up(M, tm)
    xp = _pad2d(x2d, Mp, D)
    out = pl.pallas_call(
        partial(_layernorm_kernel, eps),
        out_shape=jax.ShapeDtypeStruct((Mp, D), jnp.float32),
        grid=(Mp // tm,),
        in_specs=[
            pl.BlockSpec((tm, D), lambda i: (i, 0)),
            pl.BlockSpec((1, D), lambda i: (0, 0)),
            pl.BlockSpec((1, D), lambda i: (0, 0)),
        ],
        out_specs=pl.BlockSpec((tm, D), lambda i: (i, 0)),
        compiler_params=pltpu.CompilerParams(
            dimension_semantics=("parallel",),
            vmem_limit_bytes=_VMEM_LIMIT),
    )(xp, g.reshape(1, D), b.reshape(1, D))
    return out[:M]


# ----------------------------------------------------------------------------
# Kernel 4: flash attention — grid=(B, H, Tq/tq, Tk/tk), online softmax in
# VMEM scratch.  Key-length mask from scalar-prefetched lengths; bf16 q/k/v
# streams and bf16 output; softmax math in f32.
# ----------------------------------------------------------------------------

def _flash_mha_kernel(scale, causal, klen_ref, q_ref, k_ref, v_ref, o_ref,
                      m_sc, l_sc, acc_sc):
    b = pl.program_id(0)
    qi = pl.program_id(2)
    ki = pl.program_id(3)
    klen = klen_ref[b]

    @pl.when(ki == 0)
    def _():
        m_sc[...] = jnp.full_like(m_sc, NEG_INF)
        l_sc[...] = jnp.zeros_like(l_sc)
        acc_sc[...] = jnp.zeros_like(acc_sc)

    q = q_ref[0, 0]                                        # (tq, dk) bf16
    k = k_ref[0, 0]                                        # (tk, dk) bf16
    s = jax.lax.dot_general(q, k, (((1,), (1,)), ((), ())),
                            preferred_element_type=jnp.float32) * scale
    tq, tk = s.shape
    kcol = jax.lax.broadcasted_iota(jnp.int32, (tq, tk), 1) + ki * tk
    valid = kcol < klen
    if causal:
        qrow = jax.lax.broadcasted_iota(jnp.int32, (tq, tk), 0) + qi * tq
        valid = valid & (kcol <= qrow)
    s = jnp.where(valid, s, NEG_INF)

    m_prev = m_sc[...]
    m_new = jnp.maximum(m_prev, jnp.max(s, axis=-1, keepdims=True))
    alpha = jnp.exp(m_prev - m_new)
    p = jnp.where(valid, jnp.exp(s - m_new), 0.0)          # safe for all-masked rows
    l_sc[...] = alpha * l_sc[...] + jnp.sum(p, axis=-1, keepdims=True)
    acc_sc[...] = alpha * acc_sc[...] + jax.lax.dot_general(
        p.astype(jnp.bfloat16), v_ref[0, 0], (((1,), (0,)), ((), ())),
        preferred_element_type=jnp.float32)
    m_sc[...] = m_new

    @pl.when(ki == pl.num_programs(3) - 1)
    def _():
        l = l_sc[...]
        inv = jnp.where(l > 0.0, pl.reciprocal(l, approx=True), 0.0)
        o_ref[0, 0] = (acc_sc[...] * inv).astype(o_ref.dtype)


def pallas_flash_attention(q, k, v, k_len, causal=False, tq=256, tk=256):
    """q,k,v: (B,H,T,dk).  k_len: (B,) valid key lengths.  Returns bf16."""
    B, H, Tq, dk = q.shape
    Tk = k.shape[2]
    scale = 1.0 / math.sqrt(dk)
    tq = min(tq, _round_up(Tq, 16))
    tk = min(tk, _round_up(Tk, 16))
    Tqp, Tkp = _round_up(Tq, tq), _round_up(Tk, tk)
    q = q.astype(jnp.bfloat16)
    k = k.astype(jnp.bfloat16)
    v = v.astype(jnp.bfloat16)
    if Tqp != Tq:
        q = jnp.pad(q, ((0, 0), (0, 0), (0, Tqp - Tq), (0, 0)))
    if Tkp != Tk:
        k = jnp.pad(k, ((0, 0), (0, 0), (0, Tkp - Tk), (0, 0)))
        v = jnp.pad(v, ((0, 0), (0, 0), (0, Tkp - Tk), (0, 0)))
    klen = jnp.asarray(k_len, jnp.int32)
    out = pl.pallas_call(
        partial(_flash_mha_kernel, scale, causal),
        out_shape=jax.ShapeDtypeStruct((B, H, Tqp, dk), jnp.bfloat16),
        grid_spec=pltpu.PrefetchScalarGridSpec(
            num_scalar_prefetch=1,
            grid=(B, H, Tqp // tq, Tkp // tk),
            in_specs=[
                pl.BlockSpec((1, 1, tq, dk), lambda b, h, qi, ki, kl: (b, h, qi, 0)),
                pl.BlockSpec((1, 1, tk, dk), lambda b, h, qi, ki, kl: (b, h, ki, 0)),
                pl.BlockSpec((1, 1, tk, dk), lambda b, h, qi, ki, kl: (b, h, ki, 0)),
            ],
            out_specs=pl.BlockSpec((1, 1, tq, dk),
                                   lambda b, h, qi, ki, kl: (b, h, qi, 0)),
            scratch_shapes=[pltpu.VMEM((tq, 1), jnp.float32),
                            pltpu.VMEM((tq, 1), jnp.float32),
                            pltpu.VMEM((tq, dk), jnp.float32)],
        ),
        compiler_params=pltpu.CompilerParams(
            dimension_semantics=("parallel", "parallel", "parallel", "arbitrary"),
            vmem_limit_bytes=_VMEM_LIMIT),
    )(klen, q, k, v)
    if Tqp != Tq:
        out = out[:, :, :Tq, :]
    return out


# ----------------------------------------------------------------------------
# Kernel 5: fused [final LayerNorm] + vocab projection + cross-entropy + argmax
# (flash-CE over V tiles — logits never hit HBM)
# ----------------------------------------------------------------------------

def _lnf_ce_kernel(eps, tv, t_ref, h_ref, g_ref, beta_ref, w_ref, b_ref,
                   nll_ref, corr_ref, hn_sc, m_sc, s_sc, tgt_sc, amax_sc):
    j = pl.program_id(1)

    @pl.when(j == 0)
    def _():
        x = h_ref[...]
        mean = jnp.mean(x, axis=-1, keepdims=True)
        var = jnp.mean(jnp.square(x - mean), axis=-1, keepdims=True)
        hn_sc[...] = ((x - mean) * jax.lax.rsqrt(var + eps) * g_ref[...]
                      + beta_ref[...]).astype(jnp.bfloat16)
        m_sc[...] = jnp.full_like(m_sc, NEG_INF)
        s_sc[...] = jnp.zeros_like(s_sc)
        tgt_sc[...] = jnp.zeros_like(tgt_sc)
        amax_sc[...] = jnp.zeros_like(amax_sc)

    logits = jnp.dot(hn_sc[...], w_ref[...],
                     preferred_element_type=jnp.float32) + b_ref[...]  # (tm, tv)
    t = t_ref[...]                                                     # (tm, 1)
    col = jax.lax.broadcasted_iota(jnp.int32, logits.shape, 1) + j * tv
    # gather target logit (IGNORE_ID = -1 never matches -> contributes 0)
    tgt_sc[...] += jnp.sum(jnp.where(col == t, logits, 0.0),
                           axis=1, keepdims=True)
    # online max / argmax / logsumexp
    blk_max = jnp.max(logits, axis=1, keepdims=True)
    col_f = col.astype(jnp.float32)
    blk_arg = jnp.min(jnp.where(logits == blk_max, col_f, jnp.float32(1e9)),
                      axis=1, keepdims=True)
    m_old = m_sc[...]
    m_new = jnp.maximum(m_old, blk_max)
    s_sc[...] = (s_sc[...] * jnp.exp(m_old - m_new)
                 + jnp.sum(jnp.exp(logits - m_new), axis=1, keepdims=True))
    amax_sc[...] = jnp.where(blk_max > m_old, blk_arg, amax_sc[...])
    m_sc[...] = m_new

    @pl.when(j == pl.num_programs(1) - 1)
    def _():
        lse = m_sc[...] + jnp.log(s_sc[...])
        nll_ref[...] = lse - tgt_sc[...]
        corr_ref[...] = (amax_sc[...] == t.astype(jnp.float32)).astype(jnp.float32)


def pallas_lnf_decoder_ce(hidden2d, g, beta, w, b, targets,
                          eps=1e-5, tm=256, tv=1024):
    M, D = hidden2d.shape
    V = w.shape[1]
    tm = min(tm, _round_up(M, 16))
    tv = min(tv, _round_up(V, 128))
    Mp, Vp = _round_up(M, tm), _round_up(V, tv)
    hp = _pad2d(hidden2d, Mp, D)
    wp = _pad2d(w, D, Vp).astype(jnp.bfloat16)
    bpad = jnp.full((1, Vp), NEG_INF, jnp.float32)          # padded vocab cols -> -inf
    bpad = bpad.at[0, :V].set(b.astype(jnp.float32))
    tp = jnp.pad(targets.astype(jnp.int32), (0, Mp - M),
                 constant_values=IGNORE_ID).reshape(Mp, 1)
    nll, corr = pl.pallas_call(
        partial(_lnf_ce_kernel, eps, tv),
        out_shape=(jax.ShapeDtypeStruct((Mp, 1), jnp.float32),
                   jax.ShapeDtypeStruct((Mp, 1), jnp.float32)),
        grid=(Mp // tm, Vp // tv),
        in_specs=[
            pl.BlockSpec((tm, 1), lambda i, j: (i, 0)),
            pl.BlockSpec((tm, D), lambda i, j: (i, 0)),
            pl.BlockSpec((1, D), lambda i, j: (0, 0)),
            pl.BlockSpec((1, D), lambda i, j: (0, 0)),
            pl.BlockSpec((D, tv), lambda i, j: (0, j)),
            pl.BlockSpec((1, tv), lambda i, j: (0, j)),
        ],
        out_specs=(pl.BlockSpec((tm, 1), lambda i, j: (i, 0)),
                   pl.BlockSpec((tm, 1), lambda i, j: (i, 0))),
        scratch_shapes=[pltpu.VMEM((tm, D), jnp.bfloat16),
                        pltpu.VMEM((tm, 1), jnp.float32),
                        pltpu.VMEM((tm, 1), jnp.float32),
                        pltpu.VMEM((tm, 1), jnp.float32),
                        pltpu.VMEM((tm, 1), jnp.float32)],
        compiler_params=pltpu.CompilerParams(
            dimension_semantics=("parallel", "arbitrary"),
            vmem_limit_bytes=_VMEM_LIMIT),
    )(tp, hp, g.reshape(1, D), beta.reshape(1, D), wp, bpad)
    return nll[:M, 0], corr[:M, 0]


# ----------------------------------------------------------------------------
# Composite transformer blocks (pre-norm; dropout = identity, eval semantics)
# ----------------------------------------------------------------------------

def self_attention_block(x, klen, p, n_head, causal):
    B, T, D = x.shape
    dk = D // n_head
    qkv = pallas_ln_linear(x.reshape(-1, D), p["ln_g"], p["ln_b"],
                           p["wqkv"], p["bqkv"], out_dtype=jnp.bfloat16)
    qkv = qkv.reshape(B, T, 3, n_head, dk)
    # TODO(synk): (B,T,H,dk)->(B,H,T,dk) transposes are XLA HBM copies; a
    # head-sliced BlockSpec could consume (B,T,H,dk) directly when dk >= 128.
    q = qkv[:, :, 0].transpose(0, 2, 1, 3)
    k = qkv[:, :, 1].transpose(0, 2, 1, 3)
    v = qkv[:, :, 2].transpose(0, 2, 1, 3)
    o = pallas_flash_attention(q, k, v, klen, causal=causal)   # (B,H,T,dk) bf16
    o = o.transpose(0, 2, 1, 3).reshape(B * T, D)
    return pallas_linear(o, p["wo"], p["bo"]).reshape(B, T, D)


def cross_attention_block(x, memory, mem_klen, p, n_head):
    B, Tq, D = x.shape
    Tk = memory.shape[1]
    dk = D // n_head
    q = pallas_ln_linear(x.reshape(-1, D), p["ln_g"], p["ln_b"],
                         p["wq"], p["bq"], out_dtype=jnp.bfloat16)   # fused LN + Q
    kv = pallas_linear(memory.reshape(-1, D), p["wkv"], p["bkv"],
                       out_dtype=jnp.bfloat16)                        # fused K|V
    q = q.reshape(B, Tq, n_head, dk).transpose(0, 2, 1, 3)
    kv = kv.reshape(B, Tk, 2, n_head, dk)
    k = kv[:, :, 0].transpose(0, 2, 1, 3)
    v = kv[:, :, 1].transpose(0, 2, 1, 3)
    o = pallas_flash_attention(q, k, v, mem_klen, causal=False)
    o = o.transpose(0, 2, 1, 3).reshape(B * Tq, D)
    return pallas_linear(o, p["wo"], p["bo"]).reshape(B, Tq, D)


def ffn_block(x, p):
    B, T, D = x.shape
    h = pallas_ln_linear(x.reshape(-1, D), p["ln_g"], p["ln_b"],
                         p["w1"], p["b1"], act="relu",
                         out_dtype=jnp.bfloat16)             # fused LN + up + ReLU
    y = pallas_linear(h, p["w2"], p["b2"])
    return y.reshape(B, T, D)


def decoder_layer(tgt, tgt_klen, memory, mem_klen, p, n_head):
    """wenet DecoderLayer, normalize_before=True (norms fused into projections)."""
    x = tgt + self_attention_block(tgt, tgt_klen, p["self_attn"], n_head, causal=False)
    x = x + cross_attention_block(x, memory, mem_klen, p["src_attn"], n_head)
    x = x + ffn_block(x, p["ffn"])
    return x


def text_encoder_forward(x, klen, p, n_head):
    # TODO(synk): text_encoder is an injected module in the original; modelled
    # as one pre-norm transformer encoder layer with the same I/O contract.
    B, T, D = x.shape
    x = x + self_attention_block(x, klen, p["attn"], n_head, causal=False)
    x = x + ffn_block(x, p["ffn"])
    return pallas_layernorm(x.reshape(-1, D), p["lnf_g"], p["lnf_b"]).reshape(B, T, D)


def llm_forward_one_step(x, klen, p, n_head):
    # TODO(synk): the Qwen2 llm is an injected HF module; modelled as one
    # pre-norm causal transformer layer; its final norm is fused into the
    # decoder-head + cross-entropy kernel.
    x = x + self_attention_block(x, klen, p["attn"], n_head, causal=True)
    x = x + ffn_block(x, p["ffn"])
    return x


# ----------------------------------------------------------------------------
# Full forward (mirrors Qwen2LM_Phoneme_Src2.forward)
# ----------------------------------------------------------------------------

def qwen2lm_phoneme_src2_forward(batch, params, cfg):
    D = cfg["llm_input_size"]

    pho_token = batch["pho_token"]                       # (B, Tp, 4) int32
    pho_len_np = np.asarray(batch["pho_token_len"], np.int32)
    text_token = batch["text_token"]                     # (B, Tt) int32
    text_len_np = np.asarray(batch["text_token_len"], np.int32)
    speech_token = batch["speech_token"]                 # (B, Ts) int32
    speech_len_np = np.asarray(batch["speech_token_len"], np.int32)
    embedding = batch["embedding"]                       # (B, spk_dim) f32

    B, Tp, _ = pho_token.shape
    Ts = speech_token.shape[1]

    # ---- lm_target: vectorised build (lengths are host ints) ------------------
    T_lm = int(np.max(3 + pho_len_np + speech_len_np))
    pho_len = jnp.asarray(pho_len_np)
    speech_len = jnp.asarray(speech_len_np)
    col = jnp.arange(T_lm)[None, :]
    sp_idx = col - (2 + pho_len)[:, None]
    in_speech = (sp_idx >= 0) & (sp_idx < speech_len[:, None])
    is_eos = sp_idx == speech_len[:, None]
    gathered = jnp.take_along_axis(speech_token, jnp.clip(sp_idx, 0, Ts - 1), axis=1)
    lm_target = jnp.where(in_speech, gathered,
                          jnp.where(is_eos, cfg["speech_token_size"], IGNORE_ID)
                          ).astype(jnp.int32)

    # ---- phoneme embeddings (4 tables, prosody zeroed if unused) ---------------
    pho_embeds = []
    for i in range(4):
        emb = jnp.take(params["text_embedding"][i], pho_token[:, :, i], axis=0)
        if (not cfg["use_frontend_prsd"]) and i == 3:
            emb = emb * 0.0
        pho_embeds.append(emb)
    pho = jnp.concatenate(pho_embeds, axis=-1)           # (B, Tp, enc_in)

    # ---- encode: text_encoder + affine -----------------------------------------
    pho = text_encoder_forward(pho, pho_len_np, params["text_encoder"],
                               cfg["enc_heads"])
    pho = pallas_linear(pho.reshape(-1, pho.shape[-1]),
                        params["aff_w"], params["aff_b"]).reshape(B, Tp, D)

    # ---- llm token embedding of text --------------------------------------------
    text = jnp.take(params["embed_tokens"], text_token, axis=0)     # (B, Tt, D)

    # ---- src_attention (DecoderLayer stack, 16 heads) ---------------------------
    for layer_p in params["src_attention"]:
        pho = decoder_layer(pho, pho_len_np, text, text_len_np, layer_p, n_head=16)

    # ---- speaker embedding: F.normalize + affine --------------------------------
    norm = jnp.sqrt(jnp.sum(embedding ** 2, axis=1, keepdims=True))
    spk = embedding / jnp.maximum(norm, 1e-12)
    spk = pallas_linear(spk, params["spk_w"], params["spk_b"])      # (B, D)

    sos_eos_emb = params["llm_embedding"][0]
    task_id_emb = params["llm_embedding"][1]
    speech_emb = jnp.take(params["speech_embedding"], speech_token, axis=0)

    # ---- pad_unpad_sequence: vectorised gather (padding_value = IGNORE_ID) ------
    src = jnp.concatenate([
        jnp.broadcast_to(sos_eos_emb[None, None, :], (B, 1, D)),
        spk[:, None, :],
        pho,
        jnp.broadcast_to(task_id_emb[None, None, :], (B, 1, D)),
        speech_emb,
    ], axis=1)                                                       # (B, 3+Tp+Ts, D)
    t_col = jnp.arange(T_lm)[None, :]
    pli = pho_len[:, None]
    sli = speech_len[:, None]
    idx = jnp.where(t_col < 2 + pli, t_col,
                    jnp.where(t_col == 2 + pli, 2 + Tp,
                              3 + Tp + (t_col - (3 + pli))))
    idx = jnp.clip(idx, 0, 2 + Tp + Ts)
    row_valid = t_col < 3 + pli + sli
    lm_input = jnp.take_along_axis(src, idx[:, :, None], axis=1)
    lm_input = jnp.where(row_valid[:, :, None], lm_input, float(IGNORE_ID))
    lm_input_len_np = 3 + pho_len_np + speech_len_np

    # ---- llm + fused decoder head + cross-entropy -------------------------------
    lm_out = llm_forward_one_step(lm_input, lm_input_len_np, params["llm"], n_head=16)
    nll, corr = pallas_lnf_decoder_ce(
        lm_out.reshape(-1, D), params["llm"]["lnf_g"], params["llm"]["lnf_b"],
        params["dec_w"], params["dec_b"], lm_target.reshape(-1))

    valid = (lm_target.reshape(-1) != IGNORE_ID).astype(jnp.float32)
    total = jnp.sum(valid)
    loss = jnp.sum(nll * valid) / total
    acc = jnp.sum(corr * valid) / total
    return {"loss": loss, "acc": acc}


# ----------------------------------------------------------------------------
# Deterministic parameter init
# ----------------------------------------------------------------------------

def init_params(key, cfg):
    D = cfg["llm_input_size"]
    enc_in = cfg["text_encoder_input_size"]
    V = cfg["speech_token_size"] + 3
    keys = iter(jax.random.split(key, 128))

    def nrm(shape, scale=0.02):
        return jax.random.normal(next(keys), shape, jnp.float32) * scale

    def lin(din, dout):
        return nrm((din, dout)), jnp.zeros((dout,), jnp.float32)

    def ln_p(d):
        return jnp.ones((d,), jnp.float32), jnp.zeros((d,), jnp.float32)

    def self_attn_p(d):
        g, b = ln_p(d)
        wqkv, bqkv = lin(d, 3 * d)
        wo, bo = lin(d, d)
        return dict(ln_g=g, ln_b=b, wqkv=wqkv, bqkv=bqkv, wo=wo, bo=bo)

    def cross_attn_p(d):
        g, b = ln_p(d)
        wq, bq = lin(d, d)
        wkv, bkv = lin(d, 2 * d)
        wo, bo = lin(d, d)
        return dict(ln_g=g, ln_b=b, wq=wq, bq=bq, wkv=wkv, bkv=bkv, wo=wo, bo=bo)

    def ffn_p(d, h):
        g, b = ln_p(d)
        w1, b1 = lin(d, h)
        w2, b2 = lin(h, d)
        return dict(ln_g=g, ln_b=b, w1=w1, b1=b1, w2=w2, b2=b2)

    p = {}
    p["text_embedding"] = [
        nrm((cfg["text_token_size"], cfg["text_token_dim"])),
        nrm((cfg["text_tone_size"], cfg["text_tone_dim"])),
        nrm((cfg["text_lang_size"], cfg["text_lang_dim"])),
        nrm((cfg["text_prsd_size"], cfg["text_prsd_dim"])),
    ]
    enc = dict(attn=self_attn_p(enc_in), ffn=ffn_p(enc_in, cfg["enc_ffn"]))
    enc["lnf_g"], enc["lnf_b"] = ln_p(enc_in)
    p["text_encoder"] = enc
    p["aff_w"], p["aff_b"] = lin(enc_in, D)

    p["embed_tokens"] = nrm((cfg["llm_text_vocab"], D))

    p["src_attention"] = [dict(self_attn=self_attn_p(D),
                               src_attn=cross_attn_p(D),
                               ffn=ffn_p(D, cfg["src_ffn"]))]

    p["spk_w"], p["spk_b"] = lin(cfg["spk_embed_dim"], D)
    p["llm_embedding"] = nrm((2, D))
    p["speech_embedding"] = nrm((V, D))

    llm = dict(attn=self_attn_p(D), ffn=ffn_p(D, cfg["llm_ffn"]))
    llm["lnf_g"], llm["lnf_b"] = ln_p(D)
    p["llm"] = llm

    p["dec_w"], p["dec_b"] = lin(D, V)
    return p


# ----------------------------------------------------------------------------
if __name__ == "__main__":
    cfg = dict(
        text_encoder_input_size=128,
        llm_input_size=128, llm_output_size=128,
        text_token_size=50, text_token_dim=64,
        text_tone_size=10, text_tone_dim=32,
        text_lang_size=5, text_lang_dim=16,
        text_prsd_size=6, text_prsd_dim=16,
        speech_token_size=40,
        spk_embed_dim=32,
        llm_text_vocab=60,
        enc_heads=8, enc_ffn=256, src_ffn=256, llm_ffn=256,
        use_frontend_prsd=False,
    )
    assert (cfg["text_token_dim"] + cfg["text_tone_dim"] + cfg["text_lang_dim"]
            + cfg["text_prsd_dim"]) == cfg["text_encoder_input_size"]

    key = jax.random.PRNGKey(0)
    kp, kd = jax.random.split(key)
    params = init_params(kp, cfg)

    B, Tp, Tt, Ts = 2, 8, 10, 6
    dkeys = jax.random.split(kd, 8)
    pho_cols = []
    for j, vs in enumerate([cfg["text_token_size"], cfg["text_tone_size"],
                            cfg["text_lang_size"], cfg["text_prsd_size"]]):
        pho_cols.append(jax.random.randint(dkeys[j], (B, Tp, 1), 0, vs, jnp.int32))
    batch = {
        "pho_token": jnp.concatenate(pho_cols, axis=-1),
        "pho_token_len": np.array([8, 6], np.int32),
        "text_token": jax.random.randint(dkeys[4], (B, Tt), 0,
                                         cfg["llm_text_vocab"], jnp.int32),
        "text_token_len": np.array([10, 7], np.int32),
        "speech_token": jax.random.randint(dkeys[5], (B, Ts), 0,
                                           cfg["speech_token_size"], jnp.int32),
        "speech_token_len": np.array([6, 4], np.int32),
        "embedding": jax.random.normal(dkeys[6], (B, cfg["spk_embed_dim"]),
                                       jnp.float32),
    }

    out = qwen2lm_phoneme_src2_forward(batch, params, cfg)
    loss = jax.block_until_ready(out["loss"])
    acc = jax.block_until_ready(out["acc"])
    assert bool(jnp.isfinite(loss)) and bool(jnp.isfinite(acc))
    print("KERNEL_OK")
</pallas_src>

<mosaic_0001>
module attributes {stable_mosaic.version = 11 : i64} {
  func.func @_ln_matmul_kernel(%arg0: i32, %arg1: i32, %arg2: memref<16x128xf32, #tpu.memory_space<vmem>>, %arg3: memref<1x128xf32, #tpu.memory_space<vmem>>, %arg4: memref<1x128xf32, #tpu.memory_space<vmem>>, %arg5: memref<128x256xbf16, #tpu.memory_space<vmem>>, %arg6: memref<1x256xf32, #tpu.memory_space<vmem>>, %arg7: memref<16x256xbf16, #tpu.memory_space<vmem>>, %arg8: memref<16x128xbf16, #tpu.memory_space<vmem>>) attributes {dimension_semantics = [#tpu.dimension_semantics<parallel>, #tpu.dimension_semantics<arbitrary>], iteration_bounds = array<i64: 1, 2>, scalar_prefetch = 0 : i64, scratch_operands = 1 : i64, tpu.core_type = #tpu.core_type<tc>, window_params = [{transform_indices = @transform_0, window_bounds = array<i64: 16, 128>}, {pipeline_mode = #tpu.pipeline_mode<synchronous>, transform_indices = @transform_1, window_bounds = array<i64: 1, 128>}, {pipeline_mode = #tpu.pipeline_mode<synchronous>, transform_indices = @transform_2, window_bounds = array<i64: 1, 128>}, {transform_indices = @transform_3, window_bounds = array<i64: 128, 256>}, {transform_indices = @transform_4, window_bounds = array<i64: 1, 256>}, {transform_indices = @transform_5, window_bounds = array<i64: 16, 256>}]} {
    %c0_i32 = arith.constant 0 : i32
    %0 = arith.cmpi eq, %arg1, %c0_i32 : i32
    %1 = arith.extui %0 : i1 to i32
    %c0_i32_0 = arith.constant 0 : i32
    %2 = arith.cmpi ne, %1, %c0_i32_0 : i32
    scf.if %2 {
      %c0_8 = arith.constant 0 : index
      %c0_9 = arith.constant 0 : index
      %11 = vector.load %arg2[%c0_8, %c0_9] : memref<16x128xf32, #tpu.memory_space<vmem>>, vector<16x128xf32>
      %cst_10 = arith.constant dense<0.000000e+00> : vector<16xf32>
      %12 = vector.multi_reduction <add>, %11, %cst_10 [1] : vector<16x128xf32> to vector<16xf32>
      %13 = vector.shape_cast %12 : vector<16xf32> to vector<16x1xf32>
      %cst_11 = arith.constant 1.280000e+02 : f32
      %14 = vector.broadcast %cst_11 : f32 to vector<16x1xf32>
      %15 = arith.divf %13, %14 : vector<16x1xf32>
      %16 = vector.broadcast %15 : vector<16x1xf32> to vector<16x128xf32>
      %17 = arith.subf %11, %16 : vector<16x128xf32>
      %18 = arith.mulf %17, %17 : vector<16x128xf32>
      %cst_12 = arith.constant dense<0.000000e+00> : vector<16xf32>
      %19 = vector.multi_reduction <add>, %18, %cst_12 [1] : vector<16x128xf32> to vector<16xf32>
      %20 = vector.shape_cast %19 : vector<16xf32> to vector<16x1xf32>
      %cst_13 = arith.constant 1.280000e+02 : f32
      %21 = vector.broadcast %cst_13 : f32 to vector<16x1xf32>
      %22 = arith.divf %20, %21 : vector<16x1xf32>
      %23 = vector.broadcast %15 : vector<16x1xf32> to vector<16x128xf32>
      %24 = arith.subf %11, %23 : vector<16x128xf32>
      %cst_14 = arith.constant 9.99999974E-6 : f32
      %25 = vector.broadcast %cst_14 : f32 to vector<16x1xf32>
      %26 = arith.addf %22, %25 : vector<16x1xf32>
      %27 = math.rsqrt %26 : vector<16x1xf32>
      %28 = vector.broadcast %27 : vector<16x1xf32> to vector<16x128xf32>
      %29 = arith.mulf %24, %28 : vector<16x128xf32>
      %c0_15 = arith.constant 0 : index
      %c0_16 = arith.constant 0 : index
      %30 = vector.load %arg3[%c0_15, %c0_16] : memref<1x128xf32, #tpu.memory_space<vmem>>, vector<1x128xf32>
      %31 = vector.broadcast %30 : vector<1x128xf32> to vector<16x128xf32>
      %32 = arith.mulf %29, %31 : vector<16x128xf32>
      %c0_17 = arith.constant 0 : index
      %c0_18 = arith.constant 0 : index
      %33 = vector.load %arg4[%c0_17, %c0_18] : memref<1x128xf32, #tpu.memory_space<vmem>>, vector<1x128xf32>
      %34 = vector.broadcast %33 : vector<1x128xf32> to vector<16x128xf32>
      %35 = arith.addf %32, %34 : vector<16x128xf32>
      %36 = arith.truncf %35 : vector<16x128xf32> to vector<16x128xbf16>
      %c0_19 = arith.constant 0 : index
      %c0_20 = arith.constant 0 : index
      %37 = vector.load %arg8[%c0_19, %c0_20] : memref<16x128xbf16, #tpu.memory_space<vmem>>, vector<16x128xbf16>
      tpu.vector_store %arg8[%c0_19, %c0_20], %36 {strides = array<i32>} : memref<16x128xbf16, #tpu.memory_space<vmem>>, vector<16x128xbf16>,
    } else {
    }
    %c0 = arith.constant 0 : index
    %c0_1 = arith.constant 0 : index
    %3 = vector.load %arg8[%c0, %c0_1] : memref<16x128xbf16, #tpu.memory_space<vmem>>, vector<16x128xbf16>
    %c0_2 = arith.constant 0 : index
    %c0_3 = arith.constant 0 : index
    %4 = vector.load %arg5[%c0_2, %c0_3] : memref<128x256xbf16, #tpu.memory_space<vmem>>, vector<128x256xbf16>
    %cst = arith.constant dense<0.000000e+00> : vector<16x256xf32>
    %5 = tpu.matmul %3, %4, %cst {dimension_numbers = #tpu.dot_dimension_numbers<[1], [0], [0], [1], [0, 0, 1, 1], [], []>} : vector<16x128xbf16>, vector<128x256xbf16>, vector<16x256xf32> -> vector<16x256xf32>
    %c0_4 = arith.constant 0 : index
    %c0_5 = arith.constant 0 : index
    %6 = vector.load %arg6[%c0_4, %c0_5] : memref<1x256xf32, #tpu.memory_space<vmem>>, vector<1x256xf32>
    %7 = vector.broadcast %6 : vector<1x256xf32> to vector<16x256xf32>
    %8 = arith.addf %5, %7 : vector<16x256xf32>
    %9 = arith.truncf %8 : vector<16x256xf32> to vector<16x256xbf16>
    %c0_6 = arith.constant 0 : index
    %c0_7 = arith.constant 0 : index
    %10 = vector.load %arg7[%c0_6, %c0_7] : memref<16x256xbf16, #tpu.memory_space<vmem>>, vector<16x256xbf16>
    tpu.vector_store %arg7[%c0_6, %c0_7], %9 {strides = array<i32>} : memref<16x256xbf16, #tpu.memory_space<vmem>>, vector<16x256xbf16>,
    return
  }
  func.func @transform_0(%arg0: i32, %arg1: i32) -> (i32, i32) {
    %c0_i32 = arith.constant 0 : i32
    %c0_i32_0 = arith.constant 0 : i32
    return %arg0, %c0_i32 : i32, i32
  }
  func.func @transform_1(%arg0: i32, %arg1: i32) -> (i32, i32) {
    %c0_i32 = arith.constant 0 : i32
    %c0_i32_0 = arith.constant 0 : i32
    %c0_i32_1 = arith.constant 0 : i32
    return %c0_i32, %c0_i32_0 : i32, i32
  }
  func.func @transform_2(%arg0: i32, %arg1: i32) -> (i32, i32) {
    %c0_i32 = arith.constant 0 : i32
    %c0_i32_0 = arith.constant 0 : i32
    %c0_i32_1 = arith.constant 0 : i32
    return %c0_i32, %c0_i32_0 : i32, i32
  }
  func.func @transform_3(%arg0: i32, %arg1: i32) -> (i32, i32) {
    %c0_i32 = arith.constant 0 : i32
    %c0_i32_0 = arith.constant 0 : i32
    return %c0_i32, %arg1 : i32, i32
  }
  func.func @transform_4(%arg0: i32, %arg1: i32) -> (i32, i32) {
    %c0_i32 = arith.constant 0 : i32
    %c0_i32_0 = arith.constant 0 : i32
    return %c0_i32, %arg1 : i32, i32
  }
  func.func @transform_5(%arg0: i32, %arg1: i32) -> (i32, i32) {
    %c0_i32 = arith.constant 0 : i32
    return %arg0, %arg1 : i32, i32
  }
}

</mosaic_0001>

<bundles_post_ra>
// kernel: tpu_custom_call.1
= control target key start
LH: loop header
LB: loop body
LE: loop exit
PB: predicated region body
PF: predicated region fallthrough
CT: control target
= control target key end

     0   :  { %10 = vsyncpa [#allocation4], 0  ;;  %s1248_s0 = inlined_call_operand.hbm [shape: f32[16,128], index: 0, kind: input, shape index: {}]   ;;  %s1249_s1 = inlined_call_operand.vmem [shape: f32[1,128], index: 1, kind: input, shape index: {}]   ;;  %s1250_s2 = inlined_call_operand.vmem [shape: f32[1,128], index: 2, kind: input, shape index: {}]   ;;  %s1251_s3 = inlined_call_operand.hbm [shape: bf16[128,512], index: 3, kind: input, shape index: {}]   ;;  %s1252_s4 = inlined_call_operand.vmem [shape: f32[1,512], index: 4, kind: input, shape index: {}]   ;;  %s1253_s5 = inlined_call_operand.hbm [shape: bf16[16,512], index: 5, kind: output, shape index: {}]  }
   0x1   :  { %11 = vsyncpa [#allocation7], 0 }
   0x2   :  { %13 = vsyncpa [#allocation7 + $0x1], 0 }
   0x3   :  { %14 = vsyncpa [#allocation5], 0 }
   0x4   :  { %16 = vsyncpa [#allocation5 + $0x1], 0  ;;  %s980_s18 = smov 0   ;;  %s982_s19 = smov 0  }
   0x5   :  { %s984_s20 = smov 0   ;;  %s986_s21 = smov 0  }
   0x6   :  { %s988_s22 = smov 0   ;;  %s990_s23 = smov 0  }
   0x7 LB: > { %1264 = sst [smem:[#allocation12_spill]] %s938_s23  ;;  %s643_s24 = sadd.s32 4294967295, %s938_s23   ;;  %s938_s23 = sphi %s990_s23, %s22_s23   ;;  %s934_s22 = sphi %s988_s22, %s1287_s22   ;;  %s930_s21 = sphi %s986_s21, %s1286_s21   ;;  %s926_s20 = sphi %s984_s20, %s1285_s20   ;;  %s922_s19 = sphi %s982_s19, %s1284_s19   ;;  %s918_s18 = sphi %s980_s18, %s1283_s18  }
   0x8   : > { %s644_s25 = sadd.s32 4294967294, %s938_s23   ;;  %p116_p0 = scmp.ne.s32.totalorder %s926_s20, %s922_s19 }
   0x9   : > { %p117_p1 = scmp.eq.s32.totalorder %s938_s23, 0  ;;  %p122_p2 = scmp.ne.s32.totalorder %s922_s19, %s918_s18 }
   0xa   : > { %p1017_p3 = scmp.eq.s32.totalorder %s643_s24, 0  ;;  %p174_p5 = scmp.eq.s32.totalorder %s643_s24, 1 }
   0xb   : > { %p1021_p4 = por %p117_p1, %p116_p0  ;;  %p180_p7 = scmp.eq.s32.totalorder %s644_s25, 1 }
   0xc   : > { %s1265_s26 = scalar_select %p1017_p3, 1, 0 }
   0xd   : > { %p1027_p6 = por %p1017_p3, %p122_p2  ;;  %p1031_p8 = por %p174_p5, %p116_p0 }
   0xe   : > { %p645_p9 = scmp.ge.s32.totalorder %s938_s23, 1  ;;  %p1036_p10 = por %p180_p7, %p122_p2 }
   0xf   : > { %s1267_s28 = scalar_select %p1027_p6, 1, 0 }
  0x10   : > { %s1268_s29 = scalar_select %p1031_p8, 1, 0 }
  0x11   : > { %s1269_s30 = scalar_select %p1036_p10, 1, 0 }
  0x12   : > { %p187_p11 = scmp.lt.s32.totalorder %s938_s23, 3  ;;  %s940_s7 = smov [#allocation3]  }
  0x13   : > { %s202_s8 = sshll.u32 %s940_s7, 4  ;;  %p707_p1 = scmp.lt.s32.totalorder %s938_s23, 2  ;;  %s1045_s8 = int_to_ptr.vmem [resolvable:$true] %s202_s8 }
  0x14   : > { %p1041_p12 = pnand %p645_p9, %p187_p11  ;;  %s31_s11 = sadd.s32 1, %s934_s22 }
  0x15   : > { %p1059_p2 = pnand %p707_p1, %p1021_p4  ;;  %s794_s14 = scalar_lea.hbm %s1248_s0, 256 }
  0x16   : > { %s1270_s6 = scalar_select %p1041_p12, 1, 0 }
  0x17   : > { %p694_p13 = pneg %p1041_p12  ;;  %p795_p7 = scmp.ne.s32.totalorder %s1248_s0, %s794_s14 }
  0x18   : > { %s1272_s10 = scalar_select %p1059_p2, 1, 0 }
  0x19   : > { %p1053_p5 = pnand %p694_p13, %p1017_p3  ;;  %p801_p4 = scmp.lt.u32.totalorder %s794_s14, %s1248_s0 }
  0x1b   : > { %p796_p9 = pneg %p1053_p5 }
  0x1d   : > { %p797_p11 = pnand %p796_p9, %p795_p7 }
  0x1f   : > { %p798_p13 = pneg %p797_p11 }
  0x21   : > { %p803_p1 = pnand %p801_p4, %p798_p13 }
  0x23   : > { %806 = shalt.err (!%p803_p1)
}
  0x24   : > { %s807_s25 = scalar_lea.vmem %s1045_s8, 256  ;;  %p815_p6 = scmp.lt.s32.totalorder %s1045_s8, %s1045_s8 }
  0x25   : > { %p808_p0 = scmp.ne.s32.totalorder %s1045_s8, %s807_s25  ;;  %p816_p3 = scmp.lt.s32.totalorder %s807_s25, %s807_s25 }
  0x27   : > { %p810_p10 = pnand %p808_p0, %p796_p9  ;;  %p817_p12 = por %p816_p3, %p815_p6 }
  0x29   : > { %p811_p8 = pneg %p810_p10 }
  0x2b   : > { %p818_p2 = pnand %p817_p12, %p811_p8 }
  0x2d   : > { %821 = shalt.err (!%p818_p2)
}
  0x2e   : > { %s1262_s27 = smov 128   ;;  %s1263_s7 = smov 8  }
  0x2f   : > { %697 = dma.hbm_to_vmem [thread:$0]  (!%p1053_p5), %s1248_s0, 256, %s1045_s8, [#allocation4], %s1262_s27, %s1262_s27, %s1263_s7  }
  0x30   : > { %p32_p3 = scmp.ge.s32.totalorder %s31_s11, 2  ;;  %s109_s14 = sadd.s32 1, %s926_s20 }
  0x31   : > { %s222_s15 = sand.u32 1, %s926_s20   ;;  %s682_s24 = sshll.u32 %s934_s22, 7 }
  0x32   : > { %s1289_s11 = smov (%p32_p3, %s31_s11), 0  ;;  %s648_s16 = sshll.u32 %s222_s15, 7 }
  0x33   : > { %s106_s17 = ssub.s32 %s934_s22, %s1289_s11  ;;  %s1098_s23 = scalar_lea.hbm %s1251_s3, %s682_s24 }
  0x34   : > { %p107_p6 = scmp.eq.s32.totalorder %s106_s17, 0  ;;  %s226_s8 = scalar_lea.vmem [#allocation6], %s648_s16 }
  0x35   : > { %s233_s12 = sshll.u32 %s226_s8, 4  ;;  %s1105_s27 = scalar_lea.sflag [#allocation7], %s222_s15  ;;  %s1103_s12 = int_to_ptr.vmem [resolvable:$true] %s233_s12 }
  0x36   : > { %s1101_s13 = scalar_select %p107_p6, %s926_s20, %s109_s14  }
  0x37   : > { %s822_s7 = scalar_lea.hbm %s1098_s23, 2048  ;;  %p1273_p10 = scmp.ne.s32.totalorder %s1272_s10, 0 }
  0x38   : > { %p823_p8 = scmp.ne.s32.totalorder %s1098_s23, %s822_s7  ;;  %s827_s9 = scalar_lea.hbm %s1251_s3, 4096 }
  0x39   : > { %p824_p12 = pneg %p1273_p10  ;;  %p828_p2 = scmp.lt.u32.totalorder %s1098_s23, %s1251_s3 }
  0x3a   : > { %p829_p7 = scmp.lt.u32.totalorder %s827_s9, %s822_s7  ;;  %p831_p11 = scmp.lt.u32.totalorder %s822_s7, %s1098_s23 }
  0x3b   : > { %p825_p0 = pnand %p824_p12, %p823_p8 }
  0x3c   : > { %p830_p9 = por %p829_p7, %p828_p2 }
  0x3d   : > { %p826_p5 = pneg %p825_p0 }
  0x3e   : > { %p832_p13 = por %p831_p11, %p830_p9 }
  0x40   : > { %p833_p4 = pnand %p832_p13, %p826_p5 }
  0x42   : > { %836 = shalt.err (!%p833_p4)
}
  0x43   : > { %s837_s14 = scalar_lea.vmem %s1103_s12, 2048  ;;  %s943_s15 = smov [#allocation6]  }
  0x44   : > { %p838_p1 = scmp.ne.s32.totalorder %s1103_s12, %s837_s14  ;;  %s842_s8 = sshll.u32 %s943_s15, 4  ;;  %s843_s8 = int_to_ptr.vmem [resolvable:$false] %s842_s8 }
  0x45   : > { %s844_s17 = scalar_lea.vmem %s843_s8, 4096  ;;  %p845_p8 = scmp.lt.s32.totalorder %s1103_s12, %s843_s8 }
  0x46   : > { %p840_p3 = pnand %p838_p1, %p824_p12  ;;  %p846_p0 = scmp.lt.s32.totalorder %s844_s17, %s837_s14 }
  0x48   : > { %p841_p6 = pneg %p840_p3  ;;  %p847_p2 = por %p846_p0, %p845_p8 }
  0x4a   : > { %p848_p7 = pnand %p847_p2, %p841_p6 }
  0x4c   : > { %851 = shalt.err (!%p848_p7)
}
  0x4d   : > { %s944_s7 = smov 256   ;;  %s1274_s24 = smov 8  }
  0x4e   : > { %s1275_s9 = smov 128   ;;  %p1276_p12 = scmp.ne.s32.totalorder %s1270_s6, 0 }
  0x4f   : > { %701 = dma.hbm_to_vmem [thread:$0]  (!%p1273_p10), %s1098_s23, 2048, %s1103_s12, %s1105_s27, %s944_s7, %s1275_s9, %s1274_s24  }
  0x50   : > { %253 = sbr.rel (%p1276_p12) target bundleno = 682 (0x2aa), region = 40  ;;  %p1277_p5 = scmp.ne.s32.totalorder (!%p1276_p12), %s1265_s26, 0 }
  0x57   : > { %905 = dma.done.wait (%p1277_p5), [#allocation4], 256  }
  0x58   : > { %907 = vsyncadd (%p1277_p5), [#allocation4], 4294967040  ;;  %s1142_s16 = sand.u32 1, %s922_s19   ;;  %p1278_p10 = scmp.ne.s32.totalorder %s1267_s28, 0 }
  0x59   : > { %s653_s10 = sshll.u32 %s1142_s16, 7  ;;  %s260_s25 = scalar_lea.sflag [#allocation7], %s1142_s16 }
  0x5a   : > { %s1146_s14 = scalar_lea.vmem [#allocation6], %s653_s10 }
  0x5b   : > { %909 = dma.done.wait (%p1278_p10), %s260_s25, 2048  }
  0x5c   : > { %911 = vsyncadd (%p1278_p10), %s260_s25, 4294965248  ;;  %s654_s23 = sshll.u32 %s1142_s16, 4  ;;  %s655_s26 = sshll.u32 %s930_s21, 1 }
  0x5d   : > { %p297_p9 = scmp.lt.s32.totalorder %s655_s26, 3  ;;  %s1160_s15 = scalar_lea.vmem [#allocation8], %s654_s23 }
  0x5e   : > { %p656_p11 = scmp.ne.s32.totalorder %s930_s21, 0 }
  0x5f   : > { %s1291_s26 = smov (!%p297_p9, %s655_s26), 3  ;;  %v308_v0 = vld [vmem:[#allocation3] sm:$0xff] (!%p656_p11)  ;;  %v309_v1 = vld [vmem:[#allocation3 + $0x8] sm:$0xff] (!%p656_p11)  ;;  %v657_v18 = vld [vmem:[%s1249_s1] ss:$0 sm:$0xff] (!%p656_p11) }
  0x60   : > { %s299_s12 = scalar_lea.vmem %s1252_s4, %s1291_s26  ;;  %307 = sbr.rel (%p656_p11) target bundleno = 414 (0x19e), region = 52  ;;  %310 = vadd.xlane.f32.xlu0 (!%p656_p11), %v308_v0  ;;  %v658_v22 = vld [vmem:[%s1250_s2] ss:$0 sm:$0xff] (!%p656_p11) }
  0x64   : > { %312 = vadd.xlane.f32.xlu0 (!%p656_p11), %v309_v1 }
  0xed   : > { %v311_v2 = vpop.xlane.xlu0 %310 }
  0xee   : > { %v315_v3 = vmul.f32 0.0078125, %v311_v2 }
  0xf0   : > { %v317_v4 = vsub.f32 %v308_v0, %v315_v3 }
  0xf1   : > { %v313_v5 = vpop.xlane.xlu0 %312 }
  0xf2   : > { %v316_v6 = vmul.f32 0.0078125, %v313_v5  ;;  %v319_v7 = vmul.f32 %v317_v4, %v317_v4 }
  0xf4   : > { %v318_v8 = vsub.f32 %v309_v1, %v316_v6  ;;  %321 = vadd.xlane.f32.xlu1 %v319_v7 }
  0xf6   : > { %v320_v9 = vmul.f32 %v318_v8, %v318_v8 }
  0xf8   : > { %323 = vadd.xlane.f32.xlu1 %v320_v9 }
 0x181   : > { %v322_v10 = vpop.xlane.xlu1 %321 }
 0x182   : > { %v325_v11 = vmul.f32 0.0078125, %v322_v10 }
 0x184   : > { %v327_v12 = vadd.f32 1e-05, %v325_v11 }
 0x185   : > { %v324_v13 = vpop.xlane.xlu1 %323 }
 0x186   : > { %766 = vrsqrt.f32 %v327_v12  ;;  %v326_v14 = vmul.f32 0.0078125, %v324_v13 }
 0x188   : > { %v328_v15 = vadd.f32 1e-05, %v326_v14 }
 0x18a   : > { %768 = vrsqrt.f32 %v328_v15 }
 0x190   : > { %v767_v16 = vpop.eup %766 }
 0x191   : > { %v331_v17 = vmul.f32 %v767_v16, %v317_v4 }
 0x193   : > { %v340_v20 = vmul.f32 %v657_v18, %v331_v17 }
 0x194   : > { %v769_v19 = vpop.eup %768 }
 0x195   : > { %v332_v21 = vmul.f32 %v769_v19, %v318_v8  ;;  %v349_v24 = vadd.f32 %v658_v22, %v340_v20 }
 0x197   : > { %v341_v23 = vmul.f32 %v657_v18, %v332_v21 }
 0x199   : > { %v350_v25 = vadd.f32 %v658_v22, %v341_v23 }
 0x19b   : > { %v351_v26 = vpack.c.bf16 %v350_v25, %v349_v24 }
 0x19d   : > { %352 = vst [vmem:[#allocation2] sm:$0xff] %v351_v26 }
 0x19e PF: > { %v770_v27 = vld [vmem:[%s1146_s14 + $0x4] ss:$8 sps:$4 sm:$0xff]   ;;  %v772_v28 = vld [vmem:[%s1146_s14] ss:$8 sps:$4 sm:$0xff]   ;;  %v945_v29 = vmov 0   ;;  %v372_v45 = vlaneseq  ;;  %s685_s10 = sshll.u32 %s930_s21, 7 }
 0x19f   : > { %494 = vmatprep.mubr.bf16.mxu0 %v945_v29  ;;  %462 = vmatprep.subr.bf16.mxu0 %v770_v27  ;;  %v773_v30 = vld [vmem:[%s1146_s14 + $0x14] ss:$8 sps:$4 sm:$0xff]   ;;  %v775_v31 = vld [vmem:[%s1146_s14 + $0x10] ss:$8 sps:$4 sm:$0xff]   ;;  %v776_v32 = vld [vmem:[%s1146_s14 + $0x24] ss:$8 sps:$4 sm:$0xff]   ;;  %s1195_s26 = scalar_lea.hbm %s1253_s5, %s685_s10 }
 0x1a0   : > { %463 = vmatpush1.bf16.msra.mxu0 %v772_v28  ;;  %v778_v33 = vld [vmem:[%s1146_s14 + $0x20] ss:$8 sps:$4 sm:$0xff]   ;;  %v779_v34 = vld [vmem:[%s1146_s14 + $0x34] ss:$8 sps:$4 sm:$0xff]   ;;  %v781_v35 = vld [vmem:[%s1146_s14 + $0x30] ss:$8 sps:$4 sm:$0xff]  }
 0x1a1   : > { %464 = vmatprep.subr.bf16.mxu0 %v773_v30  ;;  %v782_v36 = vld [vmem:[%s1146_s14 + $0x44] ss:$8 sps:$4 sm:$0xff]   ;;  %v784_v37 = vld [vmem:[%s1146_s14 + $0x40] ss:$8 sps:$4 sm:$0xff]   ;;  %v785_v38 = vld [vmem:[%s1146_s14 + $0x54] ss:$8 sps:$4 sm:$0xff]  }
 0x1a2   : > { %v787_v39 = vld [vmem:[%s1146_s14 + $0x50] ss:$8 sps:$4 sm:$0xff]   ;;  %v788_v40 = vld [vmem:[%s1146_s14 + $0x64] ss:$8 sps:$4 sm:$0xff]   ;;  %v790_v41 = vld [vmem:[%s1146_s14 + $0x60] ss:$8 sps:$4 sm:$0xff]  }
 0x1a3   : > { %v791_v42 = vld [vmem:[%s1146_s14 + $0x74] ss:$8 sps:$4 sm:$0xff]   ;;  %v793_v43 = vld [vmem:[%s1146_s14 + $0x70] ss:$8 sps:$4 sm:$0xff]   ;;  %v373_v46 = vshrl.u32 %v372_v45, 7  ;;  %s536_s25 = sshll.u32 %s1160_s15, 4  ;;  %s1197_s25 = int_to_ptr.vmem [resolvable:$true] %s536_s25 }
 0x1a4   : > { %465 = vmatpush1.bf16.msra.mxu0 %v775_v31  ;;  %v353_v44 = vld [vmem:[#allocation2] sm:$0xff]  ;;  %s520_s21 = scalar_lea.sflag [#allocation5], %s1142_s16  ;;  %s852_s6 = scalar_lea.vmem %s1197_s25, 256 }
 0x1a5   : > { %466 = vmatprep.subr.bf16.mxu0 %v776_v32  ;;  %v374_v47 = vsub.s32 0, %v373_v46  ;;  %v370_v48 = vld [vmem:[%s299_s12] sm:$0x3]  ;;  %v378_v49 = vsub.s32 1, %v373_v46  ;;  %p853_p13 = scmp.ne.s32.totalorder %s1197_s25, %s852_s6  ;;  %p1279_p4 = scmp.ne.s32.totalorder %s1268_s29, 0 }
 0x1a6   : > { %s946_s27 = smov [#allocation8]  }
 0x1a7   : > { %v375_v50 = vrot.slane %v370_v48, %v374_v47  ;;  %v379_v51 = vrot.slane %v370_v48, %v378_v49  ;;  %p854_p1 = pnand %p853_p13, %p1279_p4  ;;  %s856_s12 = sshll.u32 %s946_s27, 4  ;;  %s857_s12 = int_to_ptr.vmem [resolvable:$false] %s856_s12 }
 0x1a8   : > { %467 = vmatpush1.bf16.msra.mxu0 %v778_v33  ;;  %s858_s28 = scalar_lea.vmem %s857_s12, 512  ;;  %p859_p6 = scmp.lt.s32.totalorder %s1197_s25, %s857_s12 }
 0x1a9   : > { %468 = vmatprep.subr.bf16.mxu0 %v779_v34  ;;  %p855_p3 = pneg %p854_p1  ;;  %p860_p8 = scmp.lt.s32.totalorder %s858_s28, %s852_s6 }
 0x1ab   : > { %p861_p0 = por %p860_p8, %p859_p6 }
 0x1ac   : > { %469 = vmatpush1.bf16.msra.mxu0 %v781_v35 }
 0x1ad   : > { %470 = vmatprep.subr.bf16.mxu0 %v782_v36  ;;  %p862_p2 = pnand %p861_p0, %p855_p3 }
 0x1b0   : > { %471 = vmatpush1.bf16.msra.mxu0 %v784_v37 }
 0x1b1   : > { %472 = vmatprep.subr.bf16.mxu0 %v785_v38 }
 0x1b4   : > { %473 = vmatpush1.bf16.msra.mxu0 %v787_v39 }
 0x1b5   : > { %474 = vmatprep.subr.bf16.mxu0 %v788_v40 }
 0x1b8   : > { %475 = vmatpush1.bf16.msra.mxu0 %v790_v41 }
 0x1b9   : > { %476 = vmatprep.subr.bf16.mxu0 %v791_v42 }
 0x1bc   : > { %477 = vmatpush1.bf16.msra.mxu0 %v793_v43 }
 0x1bf   : > { %495 = vmatmul.mubr.bf16.vlgmr.msra.gmra.mrb[0].mxu0 %v353_v44 }
 0x292   : > { %v496_v52 = vpop.f32.mrb[0].mxu0 }
 0x293   : > { %v497_v53 = vadd.f32 %v496_v52, %v375_v50  ;;  %v498_v54 = vpop.f32.mrb[1].mxu0 }
 0x294   : > { %v499_v55 = vadd.f32 %v498_v54, %v379_v51  ;;  %v500_v56 = vpop.f32.mrb[2].mxu0 }
 0x295   : > { %v501_v57 = vadd.f32 %v500_v56, %v375_v50  ;;  %v502_v58 = vpop.f32.mrb[3].mxu0 }
 0x296   : > { %v683_v59 = vpack.c.bf16 %v499_v55, %v497_v53  ;;  %v503_v60 = vadd.f32 %v502_v58, %v379_v51 }
 0x298   : > { %517 = vst [vmem:[%s1160_s15] sm:$0xff] %v683_v59  ;;  %v684_v61 = vpack.c.bf16 %v503_v60, %v501_v57 }
 0x29a   : > { %518 = vst [vmem:[%s1160_s15 + $0x8] sm:$0xff] %v684_v61 }
 0x29b   : > { %865 = shalt.err (!%p862_p2)
}
 0x29c   : > { %s866_s15 = scalar_lea.hbm %s1195_s26, 256  ;;  %s870_s7 = scalar_lea.hbm %s1253_s5, 512 }
 0x29d   : > { %p867_p7 = scmp.ne.s32.totalorder %s1195_s26, %s866_s15  ;;  %p871_p10 = scmp.lt.u32.totalorder %s1195_s26, %s1253_s5 }
 0x29e   : > { %p872_p9 = scmp.lt.u32.totalorder %s870_s7, %s866_s15  ;;  %p874_p13 = scmp.lt.u32.totalorder %s866_s15, %s1195_s26 }
 0x29f   : > { %p868_p12 = pnand %p867_p7, %p1279_p4 }
 0x2a0   : > { %p873_p11 = por %p872_p9, %p871_p10 }
 0x2a1   : > { %p869_p5 = pneg %p868_p12 }
 0x2a2   : > { %p875_p1 = por %p874_p13, %p873_p11 }
 0x2a4   : > { %p876_p3 = pnand %p875_p1, %p869_p5 }
 0x2a6   : > { %879 = shalt.err (!%p876_p3)
}
 0x2a7   : > { %s947_s10 = smov 128   ;;  %s948_s14 = smov 256  }
 0x2a8   : > { %s949_s23 = smov 8  }
 0x2a9   : > { %692 = dma.vmem_to_hbm [thread:$0]  (%p1279_p4), %s1197_s25, 256, %s1195_s26, %s520_s21, %s947_s10, %s948_s14, %s949_s23  }
 0x2aa PF: > { %s1280_s6 = sld [smem:[#allocation12_spill]]  ;;  %s551_s27 = sand.u32 1, %s918_s18  }
 0x2ab   : > { %p1281_p6 = scmp.ne.s32.totalorder %s1269_s30, 0  ;;  %s552_s12 = scalar_lea.sflag [#allocation5], %s551_s27 }
 0x2b0   : > { %p1282_p8 = scmp.ge.s32.totalorder %s1280_s6, 2 }
 0x2b2   : > { %p703_p0 = pnand %p1282_p8, %p1281_p6 }
 0x2b4   : > { %913 = dma.done.wait (!%p703_p0), %s552_s12, 256  }
 0x2b5   : > { %915 = vsyncadd (!%p703_p0), %s552_s12, 4294967040  ;;  %s22_s23 = sadd.s32 1, %s1280_s6   ;;  %s1283_s18 = smov %s922_s19 }
 0x2b6   : > { %p19_p2 = scmp.ge.s32.totalorder %s22_s23, 4   ;;  %s1284_s19 = smov %s926_s20 }
 0x2b7   : > { %s1285_s20 = smov %s1101_s13  ;;  %s1286_s21 = smov %s934_s22 }
 0x2b8   : > { %s1287_s22 = smov %s1289_s11  ;;  %21 = sbr.rel (!%p19_p2) target bundleno = 7 (0x7), region = 98 }
 0x2bf   :  { %557 = vsyncpa [#allocation4], 1 }
 0x2c0   :  { %559 = vsyncpa [#allocation4 + $0x1], 1 }
 0x2c1   :  { %560 = vsyncpa [#allocation7], 1 }
 0x2c2   :  { %562 = vsyncpa [#allocation7 + $0x1], 1 }
 0x2c3   :  { %563 = vsyncpa [#allocation5], 1 }
 0x2c4   :  { %565 = vsyncpa [#allocation5 + $0x1], 1 }

</bundles_post_ra>
